<compile_context>
chip_gen: v6e
topology: v6e:2x2x1
jax: 0.10.0
libtpu: 0.0.40
codegen_flags: <defaults>
</compile_context>

<pallas_src>
import functools

import jax
import jax.numpy as jnp
from jax.experimental import pallas as pl
from jax.experimental.pallas import tpu as pltpu

LN_EPS = 1e-3  # matches the reference LayerNormalization(eps=1e-3)


def _ffn_kernel(x_ref, w1_ref, b1_ref, w2_ref, b2_ref, g_ref, beta_ref,
                o_ref, acc_ref, *, d_hid):
    k = pl.program_id(1)

    @pl.when(k == 0)
    def _():
        acc_ref[...] = jnp.zeros_like(acc_ref)

    x = x_ref[...]                                              # (tm, D), MXU dtype

    # ---- w_1 chunk + ReLU: relu(x @ W1[:, chunk] + b1[chunk]) -----------------
    # ReLU per chunk is exact: hidden units partition across k chunks.
    h = jnp.dot(x, w1_ref[...], preferred_element_type=jnp.float32)
    h = jnp.maximum(h + b1_ref[...], 0.0)                       # b1 already f32

    # ---- accumulate this chunk's contribution to y = h @ W2 (f32 accumulator) -
    acc_ref[...] += jnp.dot(h.astype(w2_ref.dtype), w2_ref[...],
                            preferred_element_type=jnp.float32)

    # TODO(synk): dropout is identity here (inference / eval mode, no RNG mask).

    # ---- epilogue on the last d_inner chunk: bias + residual + LayerNorm ------
    @pl.when(k == pl.num_programs(1) - 1)
    def _():
        y = acc_ref[...] + b2_ref[...]                          # (tm, D) f32
        z = y + x.astype(jnp.float32)                           # residual
        mu = jnp.mean(z, axis=-1, keepdims=True)
        d = z - mu
        # torch.std default is unbiased (divide by N-1); eps added outside sqrt.
        var = jnp.sum(d * d, axis=-1, keepdims=True) * (1.0 / (d_hid - 1))
        sigma = jnp.sqrt(var)
        out = (d / (sigma + LN_EPS)) * g_ref[...] + beta_ref[...]   # exact LN
        o_ref[...] = out.astype(o_ref.dtype)


def _round_up(n, m):
    return ((n + m - 1) // m) * m


def _device_kind():
    try:
        return jax.devices()[0].device_kind.lower()
    except Exception:
        return ""


def _default_vmem_limit_bytes():
    """Per-generation scoped-VMEM limit with headroom for compiler scratch."""
    kind = _device_kind()
    if "v7" in kind:
        return 48 * 1024 * 1024     # 64 MiB physical per TC -> leave headroom
    if "v5" in kind or "v6" in kind:
        return 100 * 1024 * 1024    # 128 MiB physical
    return 48 * 1024 * 1024         # unknown / interpret: conservative


def positionwise_feed_forward(x, w1, b1, w2, b2, gamma, beta, *,
                              tm=None, tk=None, mxu_dtype=None):
    """x: (B, T, D).  w1 = W1^T (D, d_inner), w2 = W2^T (d_inner, D).

    mxu_dtype: optional compute dtype (e.g. jnp.bfloat16) for x/W1/W2 so the
    matmuls run on the native bf16 MXU path; accumulation and the LayerNorm
    epilogue stay f32.  Output dtype matches the input x dtype.
    """
    B, T, D = x.shape
    d_inner = w1.shape[1]
    M = B * T
    out_dtype = x.dtype

    # Row tile: 512 default (amortizes ~0.35us/step pipeline overhead on all
    # generations), 8-aligned, capped at the padded token count.
    if tm is None:
        tm = 512
    tm = max(8, (min(tm, _round_up(M, 8)) // 8) * 8)
    M_pad = _round_up(M, tm)

    # d_inner reduction tile: full dim if small, else 512 (multiple of 128) so
    # weight blocks stream through VMEM and double-buffer against MXU work.
    if tk is None:
        tk = d_inner if d_inner <= 512 else 512
    d_inner_pad = _round_up(d_inner, tk)

    x2d = x.reshape(M, D)
    if mxu_dtype is not None:
        x2d = x2d.astype(mxu_dtype)
        w1 = w1.astype(mxu_dtype)
        w2 = w2.astype(mxu_dtype)
    if M_pad != M:
        x2d = jnp.pad(x2d, ((0, M_pad - M), (0, 0)))      # padded rows sliced off
    if d_inner_pad != d_inner:
        # Zero-padded hidden units contribute relu(0 + 0) @ 0 = 0: exact.
        w1 = jnp.pad(w1, ((0, 0), (0, d_inner_pad - d_inner)))
        w2 = jnp.pad(w2, ((0, d_inner_pad - d_inner), (0, 0)))
        b1 = jnp.pad(b1, ((0, d_inner_pad - d_inner),))

    # Small params pre-cast to f32 (no per-step casts in the kernel), shaped
    # (1, N) so they map onto (sublane, lane) VMEM tiles.
    b1_2d = b1.reshape(1, d_inner_pad).astype(jnp.float32)
    b2_2d = b2.reshape(1, D).astype(jnp.float32)
    g_2d = gamma.reshape(1, D).astype(jnp.float32)
    beta_2d = beta.reshape(1, D).astype(jnp.float32)

    grid = (M_pad // tm, d_inner_pad // tk)

    bytes_accessed = int(
        x2d.size * x2d.dtype.itemsize
        + M_pad * D * jnp.dtype(out_dtype).itemsize
        + w1.size * w1.dtype.itemsize
        + w2.size * w2.dtype.itemsize
        + (b1_2d.size + b2_2d.size + g_2d.size + beta_2d.size) * 4)
    cost = pl.CostEstimate(flops=4 * M_pad * D * d_inner_pad,
                           transcendentals=2 * M_pad,
                           bytes_accessed=bytes_accessed)

    kernel = functools.partial(_ffn_kernel, d_hid=D)
    out2d = pl.pallas_call(
        kernel,
        out_shape=jax.ShapeDtypeStruct((M_pad, D), out_dtype),
        grid_spec=pltpu.PrefetchScalarGridSpec(
            num_scalar_prefetch=0,
            grid=grid,
            in_specs=[
                pl.BlockSpec((tm, D), lambda i, k: (i, 0)),   # x (resident over k)
                pl.BlockSpec((D, tk), lambda i, k: (0, k)),   # W1 chunk
                pl.BlockSpec((1, tk), lambda i, k: (0, k)),   # b1 chunk
                pl.BlockSpec((tk, D), lambda i, k: (k, 0)),   # W2 chunk
                pl.BlockSpec((1, D), lambda i, k: (0, 0)),    # b2
                pl.BlockSpec((1, D), lambda i, k: (0, 0)),    # gamma (a_2)
                pl.BlockSpec((1, D), lambda i, k: (0, 0)),    # beta  (b_2)
            ],
            out_specs=pl.BlockSpec((tm, D), lambda i, k: (i, 0)),
            scratch_shapes=[pltpu.VMEM((tm, D), jnp.float32)],   # y accumulator
        ),
        compiler_params=pltpu.CompilerParams(
            dimension_semantics=("parallel", "arbitrary"),   # M parallel, d_inner reduction
            vmem_limit_bytes=_default_vmem_limit_bytes(),
        ),
        cost_estimate=cost,
    )(x2d, w1, b1_2d, w2, b2_2d, g_2d, beta_2d)

    return out2d[:M].reshape(B, T, D)


def _reference(x, w1, b1, w2, b2, gamma, beta, compute_dtype=None):
    """Pure-JAX reference mirroring the PyTorch forward (eval mode).

    If compute_dtype is given, x/W1/W2 (and the relu output feeding W2) are
    rounded through that dtype to mirror the kernel's bf16-MXU path.
    """
    B, T, D = x.shape

    def cast(a):
        return (a.astype(compute_dtype) if compute_dtype is not None else a).astype(jnp.float32)

    x_c = cast(x.reshape(-1, D))
    h = jnp.maximum(x_c @ cast(w1) + b1.astype(jnp.float32), 0.0)
    h = cast(h)
    y = h @ cast(w2) + b2.astype(jnp.float32)
    z = (y + x_c).reshape(B, T, D)
    mu = jnp.mean(z, axis=-1, keepdims=True)
    sigma = jnp.sqrt(jnp.sum((z - mu) ** 2, axis=-1, keepdims=True) / (D - 1))
    return ((z - mu) / (sigma + LN_EPS)) * gamma.astype(jnp.float32) + beta.astype(jnp.float32)


if __name__ == "__main__":
    B, T, D, D_INNER = 2, 8, 32, 64

    key = jax.random.PRNGKey(0)
    kx, k1, kb1, k2, kb2 = jax.random.split(key, 5)

    x = jax.random.normal(kx, (B, T, D), dtype=jnp.float32)

    # nn.Linear-style init: uniform(-1/sqrt(fan_in), 1/sqrt(fan_in)).
    # Weights stored pre-transposed: w1 = W1^T (D, d_inner), w2 = W2^T (d_inner, D).
    lim1 = 1.0 / jnp.sqrt(jnp.float32(D))
    lim2 = 1.0 / jnp.sqrt(jnp.float32(D_INNER))
    w1 = jax.random.uniform(k1, (D, D_INNER), jnp.float32, -lim1, lim1)
    b1 = jax.random.uniform(kb1, (D_INNER,), jnp.float32, -lim1, lim1)
    w2 = jax.random.uniform(k2, (D_INNER, D), jnp.float32, -lim2, lim2)
    b2 = jax.random.uniform(kb2, (D,), jnp.float32, -lim2, lim2)
    gamma = jnp.ones((D,), jnp.float32)   # a_2
    beta = jnp.zeros((D,), jnp.float32)   # b_2

    # ---- f32 path: exact math, tight tolerance --------------------------------
    out = positionwise_feed_forward(x, w1, b1, w2, b2, gamma, beta)
    out = jax.block_until_ready(out)
    ref = _reference(x, w1, b1, w2, b2, gamma, beta)
    assert out.shape == (B, T, D)
    assert jnp.allclose(out, ref, atol=2e-3, rtol=2e-3), "f32 mismatch vs reference"

    # ---- bf16 MXU path (per perf review); reference uses the same bf16 weights.
    out_bf16 = positionwise_feed_forward(x, w1, b1, w2, b2, gamma, beta,
                                         mxu_dtype=jnp.bfloat16)
    out_bf16 = jax.block_until_ready(out_bf16)
    ref_bf16 = _reference(x, w1, b1, w2, b2, gamma, beta, compute_dtype=jnp.bfloat16)
    assert jnp.allclose(out_bf16, ref_bf16, atol=2e-3, rtol=2e-3), "bf16 mismatch vs reference"

    print("KERNEL_OK")
</pallas_src>

<mosaic_0001>
module attributes {stable_mosaic.version = 11 : i64} {
  func.func @_ffn_kernel(%arg0: i32, %arg1: i32, %arg2: memref<16x32xf32, #tpu.memory_space<vmem>>, %arg3: memref<32x64xf32, #tpu.memory_space<vmem>>, %arg4: memref<1x64xf32, #tpu.memory_space<vmem>>, %arg5: memref<64x32xf32, #tpu.memory_space<vmem>>, %arg6: memref<1x32xf32, #tpu.memory_space<vmem>>, %arg7: memref<1x32xf32, #tpu.memory_space<vmem>>, %arg8: memref<1x32xf32, #tpu.memory_space<vmem>>, %arg9: memref<16x32xf32, #tpu.memory_space<vmem>>, %arg10: memref<16x32xf32, #tpu.memory_space<vmem>>) attributes {dimension_semantics = [#tpu.dimension_semantics<parallel>, #tpu.dimension_semantics<arbitrary>], iteration_bounds = array<i64: 1, 1>, scalar_prefetch = 0 : i64, scratch_operands = 1 : i64, tpu.core_type = #tpu.core_type<tc>, window_params = [{transform_indices = @transform_0, window_bounds = array<i64: 16, 32>}, {transform_indices = @transform_1, window_bounds = array<i64: 32, 64>}, {transform_indices = @transform_2, window_bounds = array<i64: 1, 64>}, {transform_indices = @transform_3, window_bounds = array<i64: 64, 32>}, {pipeline_mode = #tpu.pipeline_mode<synchronous>, transform_indices = @transform_4, window_bounds = array<i64: 1, 32>}, {pipeline_mode = #tpu.pipeline_mode<synchronous>, transform_indices = @transform_5, window_bounds = array<i64: 1, 32>}, {pipeline_mode = #tpu.pipeline_mode<synchronous>, transform_indices = @transform_6, window_bounds = array<i64: 1, 32>}, {transform_indices = @transform_7, window_bounds = array<i64: 16, 32>}]} {
    %c0_i32 = arith.constant 0 : i32
    %0 = arith.cmpi eq, %arg1, %c0_i32 : i32
    %1 = arith.extui %0 : i1 to i32
    %c0_i32_0 = arith.constant 0 : i32
    %2 = arith.cmpi ne, %1, %c0_i32_0 : i32
    scf.if %2 {
      %cst_16 = arith.constant 0.000000e+00 : f32
      %19 = vector.broadcast %cst_16 : f32 to vector<16x32xf32>
      %c0_17 = arith.constant 0 : index
      %c0_18 = arith.constant 0 : index
      %20 = vector.load %arg10[%c0_17, %c0_18] : memref<16x32xf32, #tpu.memory_space<vmem>>, vector<16x32xf32>
      tpu.vector_store %arg10[%c0_17, %c0_18], %19 {strides = array<i32>} : memref<16x32xf32, #tpu.memory_space<vmem>>, vector<16x32xf32>,
    } else {
    }
    %c0 = arith.constant 0 : index
    %c0_1 = arith.constant 0 : index
    %3 = vector.load %arg2[%c0, %c0_1] : memref<16x32xf32, #tpu.memory_space<vmem>>, vector<16x32xf32>
    %c0_2 = arith.constant 0 : index
    %c0_3 = arith.constant 0 : index
    %4 = vector.load %arg3[%c0_2, %c0_3] : memref<32x64xf32, #tpu.memory_space<vmem>>, vector<32x64xf32>
    %cst = arith.constant dense<0.000000e+00> : vector<16x64xf32>
    %5 = tpu.matmul %3, %4, %cst {dimension_numbers = #tpu.dot_dimension_numbers<[1], [0], [0], [1], [0, 0, 1, 1], [], []>} : vector<16x32xf32>, vector<32x64xf32>, vector<16x64xf32> -> vector<16x64xf32>
    %c0_4 = arith.constant 0 : index
    %c0_5 = arith.constant 0 : index
    %6 = vector.load %arg4[%c0_4, %c0_5] : memref<1x64xf32, #tpu.memory_space<vmem>>, vector<1x64xf32>
    %7 = vector.broadcast %6 : vector<1x64xf32> to vector<16x64xf32>
    %8 = arith.addf %5, %7 : vector<16x64xf32>
    %cst_6 = arith.constant 0.000000e+00 : f32
    %9 = vector.broadcast %cst_6 : f32 to vector<16x64xf32>
    %10 = arith.maximumf %8, %9 : vector<16x64xf32>
    %c0_7 = arith.constant 0 : index
    %c0_8 = arith.constant 0 : index
    %11 = vector.load %arg10[%c0_7, %c0_8] : memref<16x32xf32, #tpu.memory_space<vmem>>, vector<16x32xf32>
    %c0_9 = arith.constant 0 : index
    %c0_10 = arith.constant 0 : index
    %12 = vector.load %arg5[%c0_9, %c0_10] : memref<64x32xf32, #tpu.memory_space<vmem>>, vector<64x32xf32>
    %cst_11 = arith.constant dense<0.000000e+00> : vector<16x32xf32>
    %13 = tpu.matmul %10, %12, %cst_11 {dimension_numbers = #tpu.dot_dimension_numbers<[1], [0], [0], [1], [0, 0, 1, 1], [], []>} : vector<16x64xf32>, vector<64x32xf32>, vector<16x32xf32> -> vector<16x32xf32>
    %14 = arith.addf %11, %13 : vector<16x32xf32>
    %c0_12 = arith.constant 0 : index
    %c0_13 = arith.constant 0 : index
    %15 = vector.load %arg10[%c0_12, %c0_13] : memref<16x32xf32, #tpu.memory_space<vmem>>, vector<16x32xf32>
    tpu.vector_store %arg10[%c0_12, %c0_13], %14 {strides = array<i32>} : memref<16x32xf32, #tpu.memory_space<vmem>>, vector<16x32xf32>,
    %c0_i32_14 = arith.constant 0 : i32
    %16 = arith.cmpi eq, %arg1, %c0_i32_14 : i32
    %17 = arith.extui %16 : i1 to i32
    %c0_i32_15 = arith.constant 0 : i32
    %18 = arith.cmpi ne, %17, %c0_i32_15 : i32
    scf.if %18 {
      %c0_16 = arith.constant 0 : index
      %c0_17 = arith.constant 0 : index
      %19 = vector.load %arg10[%c0_16, %c0_17] : memref<16x32xf32, #tpu.memory_space<vmem>>, vector<16x32xf32>
      %c0_18 = arith.constant 0 : index
      %c0_19 = arith.constant 0 : index
      %20 = vector.load %arg6[%c0_18, %c0_19] : memref<1x32xf32, #tpu.memory_space<vmem>>, vector<1x32xf32>
      %21 = vector.broadcast %20 : vector<1x32xf32> to vector<16x32xf32>
      %22 = arith.addf %19, %21 : vector<16x32xf32>
      %23 = arith.addf %22, %3 : vector<16x32xf32>
      %cst_20 = arith.constant dense<0.000000e+00> : vector<16xf32>
      %24 = vector.multi_reduction <add>, %23, %cst_20 [1] : vector<16x32xf32> to vector<16xf32>
      %25 = vector.shape_cast %24 : vector<16xf32> to vector<16x1xf32>
      %cst_21 = arith.constant 3.200000e+01 : f32
      %26 = vector.broadcast %cst_21 : f32 to vector<16x1xf32>
      %27 = arith.divf %25, %26 : vector<16x1xf32>
      %28 = vector.broadcast %27 : vector<16x1xf32> to vector<16x32xf32>
      %29 = arith.subf %23, %28 : vector<16x32xf32>
      %30 = arith.mulf %29, %29 : vector<16x32xf32>
      %cst_22 = arith.constant dense<0.000000e+00> : vector<16xf32>
      %31 = vector.multi_reduction <add>, %30, %cst_22 [1] : vector<16x32xf32> to vector<16xf32>
      %32 = vector.shape_cast %31 : vector<16xf32> to vector<16x1xf32>
      %cst_23 = arith.constant 0.0322580636 : f32
      %33 = vector.broadcast %cst_23 : f32 to vector<16x1xf32>
      %34 = arith.mulf %32, %33 : vector<16x1xf32>
      %35 = math.sqrt %34 : vector<16x1xf32>
      %cst_24 = arith.constant 1.000000e-03 : f32
      %36 = vector.broadcast %cst_24 : f32 to vector<16x1xf32>
      %37 = arith.addf %35, %36 : vector<16x1xf32>
      %38 = vector.broadcast %37 : vector<16x1xf32> to vector<16x32xf32>
      %39 = arith.divf %29, %38 : vector<16x32xf32>
      %c0_25 = arith.constant 0 : index
      %c0_26 = arith.constant 0 : index
      %40 = vector.load %arg7[%c0_25, %c0_26] : memref<1x32xf32, #tpu.memory_space<vmem>>, vector<1x32xf32>
      %41 = vector.broadcast %40 : vector<1x32xf32> to vector<16x32xf32>
      %42 = arith.mulf %39, %41 : vector<16x32xf32>
      %c0_27 = arith.constant 0 : index
      %c0_28 = arith.constant 0 : index
      %43 = vector.load %arg8[%c0_27, %c0_28] : memref<1x32xf32, #tpu.memory_space<vmem>>, vector<1x32xf32>
      %44 = vector.broadcast %43 : vector<1x32xf32> to vector<16x32xf32>
      %45 = arith.addf %42, %44 : vector<16x32xf32>
      %c0_29 = arith.constant 0 : index
      %c0_30 = arith.constant 0 : index
      %46 = vector.load %arg9[%c0_29, %c0_30] : memref<16x32xf32, #tpu.memory_space<vmem>>, vector<16x32xf32>
      tpu.vector_store %arg9[%c0_29, %c0_30], %45 {strides = array<i32>} : memref<16x32xf32, #tpu.memory_space<vmem>>, vector<16x32xf32>,
    } else {
    }
    return
  }
  func.func @transform_0(%arg0: i32, %arg1: i32) -> (i32, i32) {
    %c0_i32 = arith.constant 0 : i32
    %c0_i32_0 = arith.constant 0 : i32
    return %arg0, %c0_i32 : i32, i32
  }
  func.func @transform_1(%arg0: i32, %arg1: i32) -> (i32, i32) {
    %c0_i32 = arith.constant 0 : i32
    %c0_i32_0 = arith.constant 0 : i32
    return %c0_i32, %arg1 : i32, i32
  }
  func.func @transform_2(%arg0: i32, %arg1: i32) -> (i32, i32) {
    %c0_i32 = arith.constant 0 : i32
    %c0_i32_0 = arith.constant 0 : i32
    return %c0_i32, %arg1 : i32, i32
  }
  func.func @transform_3(%arg0: i32, %arg1: i32) -> (i32, i32) {
    %c0_i32 = arith.constant 0 : i32
    %c0_i32_0 = arith.constant 0 : i32
    return %arg1, %c0_i32 : i32, i32
  }
  func.func @transform_4(%arg0: i32, %arg1: i32) -> (i32, i32) {
    %c0_i32 = arith.constant 0 : i32
    %c0_i32_0 = arith.constant 0 : i32
    %c0_i32_1 = arith.constant 0 : i32
    return %c0_i32, %c0_i32_0 : i32, i32
  }
  func.func @transform_5(%arg0: i32, %arg1: i32) -> (i32, i32) {
    %c0_i32 = arith.constant 0 : i32
    %c0_i32_0 = arith.constant 0 : i32
    %c0_i32_1 = arith.constant 0 : i32
    return %c0_i32, %c0_i32_0 : i32, i32
  }
  func.func @transform_6(%arg0: i32, %arg1: i32) -> (i32, i32) {
    %c0_i32 = arith.constant 0 : i32
    %c0_i32_0 = arith.constant 0 : i32
    %c0_i32_1 = arith.constant 0 : i32
    return %c0_i32, %c0_i32_0 : i32, i32
  }
  func.func @transform_7(%arg0: i32, %arg1: i32) -> (i32, i32) {
    %c0_i32 = arith.constant 0 : i32
    %c0_i32_0 = arith.constant 0 : i32
    return %arg0, %c0_i32 : i32, i32
  }
}

</mosaic_0001>

<bundles_post_ra>
// kernel: tpu_custom_call.1
= control target key start
LH: loop header
LB: loop body
LE: loop exit
PB: predicated region body
PF: predicated region fallthrough
CT: control target
= control target key end

     0   :  { %vm31_vm0 = vcmask 261120   ;;  %s525_s0 = inlined_call_operand.vmem [shape: f32[16,32], index: 0, kind: input, shape index: {}]   ;;  %s526_s1 = inlined_call_operand.vmem [shape: f32[32,64], index: 1, kind: input, shape index: {}]   ;;  %s527_s2 = inlined_call_operand.vmem [shape: f32[1,64], index: 2, kind: input, shape index: {}]   ;;  %s528_s3 = inlined_call_operand.vmem [shape: f32[64,32], index: 3, kind: input, shape index: {}]   ;;  %s529_s4 = inlined_call_operand.vmem [shape: f32[1,32], index: 4, kind: input, shape index: {}]   ;;  %s530_s5 = inlined_call_operand.vmem [shape: f32[1,32], index: 5, kind: input, shape index: {}]   ;;  %s531_s6 = inlined_call_operand.vmem [shape: f32[1,32], index: 6, kind: input, shape index: {}]   ;;  %s532_s7 = inlined_call_operand.hbm [shape: f32[16,32], index: 7, kind: output, shape index: {}]  }
   0x1   :  { %v39_v0 = vld [vmem:[%s526_s1 + $0x18] sm:$0xff]  ;;  %v38_v1 = vld [vmem:[%s526_s1 + $0x10] sm:$0xff]  ;;  %v461_v2 = vld [vmem:[%s525_s0] sm:$0xff] }
   0x2   :  { %344 = vmatprep.subr.mxu0 %v39_v0  ;;  %v37_v3 = vld [vmem:[%s526_s1 + $0x8] sm:$0xff]  ;;  %352 = vmatprep.mubr.msk.f32.mxu0 %vm31_vm0, %v461_v2  ;;  %v140_v4 = vld [vmem:[%s528_s3 + $0x38] sm:$0xff]  ;;  %v139_v5 = vld [vmem:[%s528_s3 + $0x30] sm:$0xff] }
   0x3   :  { %345 = vmatpush3.msra.mxu0 %v39_v0  ;;  %355 = vmatprep.subr.mxu1 %v140_v4 }
   0x4   :  { %346 = vmatprep.subr.mxu0 %v38_v1 }
   0x5   :  { %12 = vsyncpa [#allocation4], 0  ;;  %347 = vmatpush3.msra.mxu0 %v38_v1  ;;  %v36_v6 = vld [vmem:[%s526_s1] sm:$0xff]  ;;  %356 = vmatpush3.msra.mxu1 %v140_v4  ;;  %v138_v7 = vld [vmem:[%s528_s3 + $0x28] sm:$0xff]  ;;  %v408_v14 = vmov 0.0   ;;  %vm141_vm1 = vcmask 523264  }
   0x6   :  { %348 = vmatprep.subr.mxu0 %v37_v3  ;;  %357 = vmatprep.subr.mxu1 %v139_v5  ;;  %v35_v8 = vld [vmem:[%s525_s0 + $0x8] sm:$0xff]  ;;  %v137_v9 = vld [vmem:[%s528_s3 + $0x20] sm:$0xff]  ;;  %v136_v10 = vld [vmem:[%s528_s3 + $0x18] sm:$0xff]  ;;  %33 = vst.msk [vmem:[#allocation2 + $0x8] sm:$0xff] %vm31_vm0, %v408_v14  ;;  %s409_s9 = smov [#allocation3]  }
   0x7   :  { %349 = vmatpush3.msra.mxu0 %v37_v3  ;;  %358 = vmatpush3.msra.mxu1 %v139_v5  ;;  %v135_v11 = vld [vmem:[%s528_s3 + $0x10] sm:$0xff]  ;;  %v134_v12 = vld [vmem:[%s528_s3 + $0x8] sm:$0xff]  ;;  %v133_v13 = vld [vmem:[%s528_s3] sm:$0xff]  ;;  %32 = vst.msk [vmem:[#allocation2] sm:$0xff] %vm31_vm0, %v408_v14  ;;  %s309_s10 = sshll.u32 %s409_s9, 4  ;;  %s310_s10 = int_to_ptr.vmem [resolvable:$true] %s309_s10 }
   0x8   :  { %350 = vmatprep.subr.mxu0 %v36_v6  ;;  %359 = vmatprep.subr.mxu1 %v138_v7  ;;  %v320_v15 = vld [vmem:[%s527_s2] ss:$0 sm:$0xff]  ;;  %s386_s11 = scalar_lea.vmem %s310_s10, 256  ;;  %p391_p1 = scmp.lt.s32.totalorder %s310_s10, %s310_s10 }
   0x9   :  { %351 = vmatpush3.msra.mxu0 %v36_v6  ;;  %360 = vmatpush3.msra.mxu1 %v138_v7  ;;  %v325_v28 = vld [vmem:[%s529_s4] ss:$0 sm:$0xff]  ;;  %p387_p0 = scmp.ne.s32.totalorder %s310_s10, %s386_s11  ;;  %p392_p2 = scmp.lt.s32.totalorder %s386_s11, %s386_s11 }
   0xa   :  { %353 = vmatmul.mubr.msk.f32.vlgmr.msra.gmra.mxu0 %vm31_vm0, %v35_v8  ;;  %361 = vmatprep.subr.mxu1 %v137_v9  ;;  %v326_v0 = vld [vmem:[%s530_s5] ss:$0 sm:$0xff] }
   0xb   :  { %362 = vmatpush3.msra.mxu1 %v137_v9  ;;  %p393_p3 = por %p392_p2, %p391_p1 }
   0xc   :  { %363 = vmatprep.subr.mxu1 %v136_v10 }
   0xd   :  { %364 = vmatpush3.msra.mxu1 %v136_v10  ;;  %v132_v22 = vld [vmem:[#allocation2 + $0x8] sm:$0xff]  ;;  %p394_p4 = pnand %p393_p3, %p387_p0 }
   0xe   :  { %365 = vmatprep.subr.mxu1 %v135_v11  ;;  %v131_v24 = vld [vmem:[#allocation2] sm:$0xff] }
   0xf   :  { %366 = vmatpush3.msra.mxu1 %v135_v11 }
  0x10   :  { %367 = vmatprep.subr.mxu1 %v134_v12 }
  0x11   :  { %368 = vmatpush3.msra.mxu1 %v134_v12 }
  0x12   :  { %369 = vmatprep.subr.mxu1 %v133_v13 }
  0x13   :  { %370 = vmatpush3.msra.mxu1 %v133_v13 }
  0xca   :  { %v354_v16 = vpop.f32.mrf.mxu0 }
  0xcb   :  { %v126_v17 = vadd.f32 %v354_v16, %v320_v15 }
  0xcc   :  { %v120_v18 = vpop.f32.mrf.mxu0 }
  0xcd   :  { %v121_v19 = vadd.f32 %v320_v15, %v120_v18  ;;  %v130_v21 = vmax.f32 %v126_v17, 0.0 }
  0xcf   :  { %v129_v20 = vmax.f32 %v121_v19, 0.0 }
  0xd1   :  { %371 = vmatprep.mubr.msk.f32.mxu1 %vm141_vm1, %v129_v20 }
  0xd2   :  { %372 = vmatmul.mubr.msk.f32.vlgmr.msra.gmra.mxu1 %vm141_vm1, %v130_v21 }
 0x192   :  { %v373_v23 = vpop.f32.mrf.mxu1 }
 0x193   :  { %v224_v25 = vadd.f32 %v373_v23, %v132_v22 }
 0x194   :  { %v214_v26 = vpop.f32.mrf.mxu1 }
 0x195   :  { %226 = vst.msk [vmem:[#allocation2 + $0x8] sm:$0xff] %vm31_vm0, %v224_v25  ;;  %v223_v27 = vadd.f32 %v214_v26, %v131_v24 }
 0x197   :  { %225 = vst.msk [vmem:[#allocation2] sm:$0xff] %vm31_vm0, %v223_v27 }
 0x19c   :  { %v231_v29 = vld [vmem:[#allocation2 + $0x8] sm:$0xff] }
 0x19d   :  { %v240_v32 = vadd.f32 %v325_v28, %v231_v29 }
 0x19e   :  { %v230_v30 = vld [vmem:[#allocation2] sm:$0xff] }
 0x19f   :  { %v239_v31 = vadd.f32 %v325_v28, %v230_v30  ;;  %v242_v35 = vadd.f32 %v240_v32, %v35_v8 }
 0x1a1   :  { %v241_v33 = vadd.f32 %v239_v31, %v461_v2  ;;  %v246_v36 = vsel %vm31_vm0, %v242_v35, 0.0  ;;  %v327_v2 = vld [vmem:[%s531_s6] ss:$0 sm:$0xff] }
 0x1a3   :  { %v243_v34 = vsel %vm31_vm0, %v241_v33, 0.0 }
 0x1a4   :  { %244 = vadd.xlane.f32.xlu0 %v243_v34 }
 0x1a8   :  { %247 = vadd.xlane.f32.xlu0 %v246_v36 }
 0x22d   :  { %v245_v37 = vpop.xlane.xlu0 %244 }
 0x22e   :  { %v250_v38 = vmul.f32 0.03125, %v245_v37 }
 0x230   :  { %v252_v39 = vsub.f32 %v241_v33, %v250_v38 }
 0x231   :  { %v248_v40 = vpop.xlane.xlu0 %247 }
 0x232   :  { %v251_v41 = vmul.f32 0.03125, %v248_v40  ;;  %v254_v42 = vmul.f32 %v252_v39, %v252_v39 }
 0x234   :  { %v253_v43 = vsub.f32 %v242_v35, %v251_v41  ;;  %v256_v44 = vsel %vm31_vm0, %v254_v42, 0.0 }
 0x235   :  { %257 = vadd.xlane.f32.xlu1 %v256_v44 }
 0x236   :  { %v255_v45 = vmul.f32 %v253_v43, %v253_v43 }
 0x238   :  { %v259_v46 = vsel %vm31_vm0, %v255_v45, 0.0 }
 0x239   :  { %260 = vadd.xlane.f32.xlu1 %v259_v46 }
 0x2be   :  { %v258_v47 = vpop.xlane.xlu1 %257 }
 0x2bf   :  { %v262_v48 = vmul.f32 0.032258064, %v258_v47 }
 0x2c1   :  { %378 = vrsqrt.f32 %v262_v48  ;;  %vm266_vm2 = vcmp.eq.f32.partialorder %v262_v48, inf  ;;  %v269_v53 = vand.u32 2147483648, %v262_v48  ;;  %vm268_vm3 = vcmp.eq.f32.partialorder %v262_v48, 0.0 }
 0x2c2   :  { %v261_v49 = vpop.xlane.xlu1 %260 }
 0x2c3   :  { %v263_v50 = vmul.f32 0.032258064, %v261_v49 }
 0x2c5   :  { %380 = vrsqrt.f32 %v263_v50  ;;  %vm273_vm4 = vcmp.eq.f32.partialorder %v263_v50, inf  ;;  %v276_v59 = vand.u32 2147483648, %v263_v50  ;;  %vm275_vm5 = vcmp.eq.f32.partialorder %v263_v50, 0.0 }
 0x2ce   :  { %v379_v51 = vpop.eup %378 }
 0x2cf   :  { %v265_v52 = vmul.f32 %v379_v51, %v262_v48 }
 0x2d1   :  { %v267_v54 = vsel %vm266_vm2, %v262_v48, %v265_v52 }
 0x2d2   :  { %v381_v55 = vpop.eup %380  ;;  %v270_v56 = vsel %vm268_vm3, %v269_v53, %v267_v54 }
 0x2d3   :  { %v278_v57 = vadd.f32 0.001, %v270_v56  ;;  %v272_v58 = vmul.f32 %v381_v55, %v263_v50 }
 0x2d5   :  { %382 = vrcp.f32 %v278_v57  ;;  %v274_v60 = vsel %vm273_vm4, %v263_v50, %v272_v58 }
 0x2d6   :  { %v277_v61 = vsel %vm275_vm5, %v276_v59, %v274_v60 }
 0x2d7   :  { %v279_v62 = vadd.f32 0.001, %v277_v61 }
 0x2d9   :  { %384 = vrcp.f32 %v279_v62 }
 0x2e2   :  { %v383_v63 = vpop.eup %382 }
 0x2e3   :  { %v281_v1 = vmul.f32 %v383_v63, %v252_v39 }
 0x2e5   :  { %v291_v3 = vmul.f32 %v326_v0, %v281_v1 }
 0x2e6   :  { %v385_v4 = vpop.eup %384 }
 0x2e7   :  { %v283_v5 = vmul.f32 %v385_v4, %v253_v43  ;;  %v300_v6 = vadd.f32 %v327_v2, %v291_v3 }
 0x2e9   :  { %v292_v7 = vmul.f32 %v326_v0, %v283_v5  ;;  %302 = vst.msk [vmem:[#allocation3] sm:$0xff] %vm31_vm0, %v300_v6 }
 0x2eb   :  { %v301_v8 = vadd.f32 %v327_v2, %v292_v7 }
 0x2ed   :  { %303 = vst.msk [vmem:[#allocation3 + $0x8] sm:$0xff] %vm31_vm0, %v301_v8 }
 0x2ee   :  { %397 = shalt.err (!%p394_p4)
}
 0x2ef   :  { %s410_s5 = smov 128   ;;  %s411_s6 = smov 8  }
 0x2f0   :  { %315 = dma.vmem_to_hbm [thread:$0]  %s310_s10, 256, %s532_s7, [#allocation4], %s410_s5, %s410_s5, %s411_s6  }
 0x2f1   :  { %406 = dma.done.wait [#allocation4], 256  }
 0x2f2   :  { %407 = vsyncadd [#allocation4], 4294967040 }
 0x2f3   :  { %319 = vsyncpa [#allocation4], 1 }

</bundles_post_ra>
